<compile_context>
chip_gen: v5e
topology: v5e:2x2
jax: 0.10.0
libtpu: 0.0.40
codegen_flags: <defaults>
</compile_context>

<pallas_src>
import functools
import math

import jax
import jax.numpy as jnp
from jax.experimental import pallas as pl
from jax.experimental.pallas import tpu as pltpu

LN_EPS = 1e-5  # torch.nn.LayerNorm default


def _layer_norm(v, w, b):
    mu = jnp.mean(v, axis=-1, keepdims=True)
    var = jnp.mean(jnp.square(v - mu), axis=-1, keepdims=True)
    return (v - mu) * jax.lax.rsqrt(var + LN_EPS) * w + b


def _gelu_exact(x):
    # exact (erf-based) GELU, matching nn.GELU() default (approximate='none')
    return 0.5 * x * (1.0 + jax.lax.erf(x * (1.0 / math.sqrt(2.0))))


_PARAM_ORDER_LS = ('ln1_w', 'ln1_b', 'wqkv', 'bqkv', 'wo', 'bo', 'ls1',
                   'ln2_w', 'ln2_b', 'wfc', 'bfc', 'wproj', 'bproj', 'ls2')
_PARAM_ORDER_NOLS = ('ln1_w', 'ln1_b', 'wqkv', 'bqkv', 'wo', 'bo',
                     'ln2_w', 'ln2_b', 'wfc', 'bfc', 'wproj', 'bproj')


def transformer_kernel(*refs, n_head, has_mask, use_ls):
    """Fused transformer: grid=(batch, layers).

    refs = [x_ref, (mask_ref), *weight_refs(layer-sliced), o_ref, ctx_scratch]
    The output block is the resident activation accumulator across the layer
    axis (index_map depends only on batch).
    """
    idx = 0
    x_ref = refs[idx]; idx += 1
    mask_ref = None
    if has_mask:
        mask_ref = refs[idx]; idx += 1
    n_w = 14 if use_ls else 12
    w = refs[idx:idx + n_w]; idx += n_w
    o_ref = refs[idx]; idx += 1
    ctx_ref = refs[idx]                       # (L, D) bf16 VMEM scratch

    if use_ls:
        (ln1_w, ln1_b, wqkv, bqkv, wo, bo, ls1,
         ln2_w, ln2_b, wfc, bfc, wproj, bproj, ls2) = w
    else:
        (ln1_w, ln1_b, wqkv, bqkv, wo, bo,
         ln2_w, ln2_b, wfc, bfc, wproj, bproj) = w
        ls1 = ls2 = None

    layer = pl.program_id(1)

    @pl.when(layer == 0)
    def _():
        o_ref[...] = x_ref[...]               # load residual stream once per batch

    x = o_ref[...].astype(jnp.float32)        # (L, D)
    L, D = x.shape
    dh = D // n_head
    scale = 1.0 / math.sqrt(dh)

    # ---- attention branch: x + ls1 * out_proj(MHA(LN1(x))) ----
    h = _layer_norm(x, ln1_w[...], ln1_b[...])
    qkv = jnp.dot(h.astype(jnp.bfloat16), wqkv[...],
                  preferred_element_type=jnp.float32) + bqkv[...]   # (L, 3D) f32
    qkv_b = qkv.astype(jnp.bfloat16)

    if has_mask:
        mask = mask_ref[...]

    for hd in range(n_head):                  # static unrolled over heads
        qh = qkv_b[:, 0 * D + hd * dh: 0 * D + (hd + 1) * dh]   # (L, dh) bf16
        kh = qkv_b[:, 1 * D + hd * dh: 1 * D + (hd + 1) * dh]
        vh = qkv_b[:, 2 * D + hd * dh: 2 * D + (hd + 1) * dh]
        s = jax.lax.dot_general(qh, kh, (((1,), (1,)), ((), ())),
                                preferred_element_type=jnp.float32) * scale
        if has_mask:
            s = s + mask
        m = jnp.max(s, axis=-1, keepdims=True)
        p = jnp.exp(s - m)
        inv = pl.reciprocal(jnp.sum(p, axis=-1, keepdims=True), approx=True)
        attn = (p * inv).astype(jnp.bfloat16)
        # write this head's context straight into its lane slice (no concat)
        ctx_ref[:, hd * dh:(hd + 1) * dh] = jnp.dot(
            attn, vh, preferred_element_type=jnp.float32).astype(jnp.bfloat16)

    attn_out = jnp.dot(ctx_ref[...], wo[...],
                       preferred_element_type=jnp.float32) + bo[...]
    if use_ls:
        attn_out = attn_out * ls1[...]
    x = x + attn_out

    # ---- MLP branch: x + ls2 * c_proj(gelu(c_fc(LN2(x)))) ----
    h2 = _layer_norm(x, ln2_w[...], ln2_b[...])
    ff = jnp.dot(h2.astype(jnp.bfloat16), wfc[...],
                 preferred_element_type=jnp.float32) + bfc[...]
    ff = _gelu_exact(ff)
    ff = jnp.dot(ff.astype(jnp.bfloat16), wproj[...],
                 preferred_element_type=jnp.float32) + bproj[...]
    if use_ls:
        ff = ff * ls2[...]

    o_ref[...] = (x + ff).astype(o_ref.dtype)


def transformer_forward(x, params, heads, attn_mask=None):
    """x: (L, N, D) — PyTorch (seq, batch, width) convention. Returns same shape."""
    L, N, D = x.shape
    layers = len(params)
    assert D % heads == 0
    use_ls = 'ls1' in params[0]
    has_mask = attn_mask is not None
    order = _PARAM_ORDER_LS if use_ls else _PARAM_ORDER_NOLS

    xb = jnp.transpose(x, (1, 0, 2))          # (N, L, D) batch-major for the kernel

    # stack per-layer params with a leading layer axis (all 3-D)
    stacked = [jnp.stack([p[k] for p in params], axis=0) for k in order]

    inputs = [xb]
    in_specs = [pl.BlockSpec((None, L, D), lambda b, l: (b, 0, 0))]
    if has_mask:
        inputs.append(attn_mask.astype(jnp.float32))
        in_specs.append(pl.BlockSpec((L, L), lambda b, l: (0, 0)))
    for wst in stacked:
        inputs.append(wst)
        in_specs.append(pl.BlockSpec((None,) + wst.shape[1:],
                                     lambda b, l: (l, 0, 0)))

    kernel = functools.partial(transformer_kernel, n_head=heads,
                               has_mask=has_mask, use_ls=use_ls)

    out = pl.pallas_call(
        kernel,
        out_shape=jax.ShapeDtypeStruct((N, L, D), x.dtype),
        grid=(N, layers),
        in_specs=in_specs,
        out_specs=pl.BlockSpec((None, L, D), lambda b, l: (b, 0, 0)),
        scratch_shapes=[pltpu.VMEM((L, D), jnp.bfloat16)],   # per-head ctx slab
        compiler_params=pltpu.CompilerParams(
            dimension_semantics=("parallel", "arbitrary"),
            vmem_limit_bytes=64 * 1024 * 1024),
    )(*inputs)

    return jnp.transpose(out, (1, 0, 2))      # back to (L, N, D)
    # TODO(synk): for very long sequences, additionally tile L (flash-style)
    # so the (L, 4D) MLP intermediate and (L, L) scores are chunked.


def init_transformer_params(key, width, layers, mlp_ratio=4.0, ls_init_value=None):
    """Deterministic synthetic params. Matmul weights pre-cast to bf16 (MXU),
    LN / biases / LayerScale kept in f32 (VPU). Weights pre-transposed to x@W."""
    D = width
    M = int(width * mlp_ratio)
    params = []
    for li in range(layers):
        k = jax.random.fold_in(key, li)
        ks = jax.random.split(k, 12)
        lp = {
            'ln1_w': 1.0 + 0.1 * jax.random.normal(ks[0], (1, D), jnp.float32),
            'ln1_b': 0.05 * jax.random.normal(ks[1], (1, D), jnp.float32),
            'wqkv': (0.02 * jax.random.normal(ks[2], (D, 3 * D), jnp.float32)
                     ).astype(jnp.bfloat16),
            'bqkv': 0.02 * jax.random.normal(ks[3], (1, 3 * D), jnp.float32),
            'wo': (0.02 * jax.random.normal(ks[4], (D, D), jnp.float32)
                   ).astype(jnp.bfloat16),
            'bo': 0.02 * jax.random.normal(ks[5], (1, D), jnp.float32),
            'ln2_w': 1.0 + 0.1 * jax.random.normal(ks[6], (1, D), jnp.float32),
            'ln2_b': 0.05 * jax.random.normal(ks[7], (1, D), jnp.float32),
            'wfc': (0.02 * jax.random.normal(ks[8], (D, M), jnp.float32)
                    ).astype(jnp.bfloat16),
            'bfc': 0.02 * jax.random.normal(ks[9], (1, M), jnp.float32),
            'wproj': (0.02 * jax.random.normal(ks[10], (M, D), jnp.float32)
                      ).astype(jnp.bfloat16),
            'bproj': 0.02 * jax.random.normal(ks[11], (1, D), jnp.float32),
        }
        if ls_init_value is not None:
            lp['ls1'] = float(ls_init_value) * jnp.ones((1, D), jnp.float32)
            lp['ls2'] = float(ls_init_value) * jnp.ones((1, D), jnp.float32)
        params.append(lp)
    return params


# ---------------- pure-JAX reference (sanity check only) ----------------
def _ref_block(xb, mask, lp, n_head):
    N, L, D = xb.shape
    dh = D // n_head
    scale = 1.0 / math.sqrt(dh)
    h = _layer_norm(xb, lp['ln1_w'], lp['ln1_b'])
    qkv = h @ lp['wqkv'].astype(jnp.float32) + lp['bqkv']
    q = qkv[..., :D].reshape(N, L, n_head, dh)
    k = qkv[..., D:2 * D].reshape(N, L, n_head, dh)
    v = qkv[..., 2 * D:].reshape(N, L, n_head, dh)
    s = jnp.einsum('nqhd,nkhd->nhqk', q, k) * scale
    if mask is not None:
        s = s + mask[None, None]
    a = jax.nn.softmax(s, axis=-1)
    ctx = jnp.einsum('nhqk,nkhd->nqhd', a, v).reshape(N, L, D)
    attn_out = ctx @ lp['wo'].astype(jnp.float32) + lp['bo']
    if 'ls1' in lp:
        attn_out = attn_out * lp['ls1']
    xb = xb + attn_out
    h2 = _layer_norm(xb, lp['ln2_w'], lp['ln2_b'])
    ff = _gelu_exact(h2 @ lp['wfc'].astype(jnp.float32) + lp['bfc'])
    ff = ff @ lp['wproj'].astype(jnp.float32) + lp['bproj']
    if 'ls2' in lp:
        ff = ff * lp['ls2']
    return xb + ff


def ref_forward(x, params, heads, attn_mask=None):
    mask = None if attn_mask is None else attn_mask.astype(jnp.float32)
    xb = jnp.transpose(x, (1, 0, 2))
    for lp in params:
        xb = _ref_block(xb, mask, lp, heads)
    return jnp.transpose(xb, (1, 0, 2))


if __name__ == "__main__":
    # Small config: Transformer(width=32, layers=2, heads=4), seq=8, batch=2.
    L, N, D, H, LAYERS = 8, 2, 32, 4, 2

    key = jax.random.PRNGKey(0)
    kx, kp = jax.random.split(key)
    x = jax.random.normal(kx, (L, N, D), jnp.float32)     # (seq, batch, width)

    # variant 1: defaults (no attn_mask, LayerScale = Identity)
    params = init_transformer_params(kp, width=D, layers=LAYERS, mlp_ratio=4.0,
                                     ls_init_value=None)
    out = jax.block_until_ready(transformer_forward(x, params, heads=H))
    assert out.shape == (L, N, D) and out.dtype == jnp.float32
    ref = jax.block_until_ready(ref_forward(x, params, heads=H))
    assert jnp.allclose(out, ref, rtol=1e-2, atol=1e-2), "mismatch (no mask)"

    # variant 2: causal additive mask + LayerScale enabled
    params2 = init_transformer_params(kp, width=D, layers=LAYERS, mlp_ratio=4.0,
                                      ls_init_value=0.1)
    causal = jnp.triu(jnp.full((L, L), -jnp.inf, jnp.float32), k=1)
    out2 = jax.block_until_ready(
        transformer_forward(x, params2, heads=H, attn_mask=causal))
    ref2 = jax.block_until_ready(
        ref_forward(x, params2, heads=H, attn_mask=causal))
    assert jnp.allclose(out2, ref2, rtol=1e-2, atol=1e-2), "mismatch (mask+ls)"

    print("KERNEL_OK")
</pallas_src>

<mosaic_0001>
module attributes {stable_mosaic.version = 11 : i64} {
  func.func @transformer_kernel(%arg0: i32, %arg1: i32, %arg2: memref<1x8x32xf32, #tpu.memory_space<vmem>>, %arg3: memref<1x1x32xf32, #tpu.memory_space<vmem>>, %arg4: memref<1x1x32xf32, #tpu.memory_space<vmem>>, %arg5: memref<1x32x96xbf16, #tpu.memory_space<vmem>>, %arg6: memref<1x1x96xf32, #tpu.memory_space<vmem>>, %arg7: memref<1x32x32xbf16, #tpu.memory_space<vmem>>, %arg8: memref<1x1x32xf32, #tpu.memory_space<vmem>>, %arg9: memref<1x1x32xf32, #tpu.memory_space<vmem>>, %arg10: memref<1x1x32xf32, #tpu.memory_space<vmem>>, %arg11: memref<1x32x128xbf16, #tpu.memory_space<vmem>>, %arg12: memref<1x1x128xf32, #tpu.memory_space<vmem>>, %arg13: memref<1x128x32xbf16, #tpu.memory_space<vmem>>, %arg14: memref<1x1x32xf32, #tpu.memory_space<vmem>>, %arg15: memref<1x8x32xf32, #tpu.memory_space<vmem>>, %arg16: memref<8x32xbf16, #tpu.memory_space<vmem>>) attributes {dimension_semantics = [#tpu.dimension_semantics<parallel>, #tpu.dimension_semantics<arbitrary>], iteration_bounds = array<i64: 2, 2>, scalar_prefetch = 0 : i64, scratch_operands = 1 : i64, tpu.core_type = #tpu.core_type<tc>, window_params = [{transform_indices = @transform_0, window_bounds = array<i64: 1, 8, 32>}, {transform_indices = @transform_1, window_bounds = array<i64: 1, 1, 32>}, {transform_indices = @transform_2, window_bounds = array<i64: 1, 1, 32>}, {transform_indices = @transform_3, window_bounds = array<i64: 1, 32, 96>}, {transform_indices = @transform_4, window_bounds = array<i64: 1, 1, 96>}, {transform_indices = @transform_5, window_bounds = array<i64: 1, 32, 32>}, {transform_indices = @transform_6, window_bounds = array<i64: 1, 1, 32>}, {transform_indices = @transform_7, window_bounds = array<i64: 1, 1, 32>}, {transform_indices = @transform_8, window_bounds = array<i64: 1, 1, 32>}, {transform_indices = @transform_9, window_bounds = array<i64: 1, 32, 128>}, {transform_indices = @transform_10, window_bounds = array<i64: 1, 1, 128>}, {transform_indices = @transform_11, window_bounds = array<i64: 1, 128, 32>}, {transform_indices = @transform_12, window_bounds = array<i64: 1, 1, 32>}, {transform_indices = @transform_13, window_bounds = array<i64: 1, 8, 32>}]} {
    %c0_i32 = arith.constant 0 : i32
    %0 = arith.cmpi eq, %arg1, %c0_i32 : i32
    %1 = arith.extui %0 : i1 to i32
    %c0_i32_0 = arith.constant 0 : i32
    %2 = arith.cmpi ne, %1, %c0_i32_0 : i32
    scf.if %2 {
      %c0_85 = arith.constant 0 : index
      %c0_86 = arith.constant 0 : index
      %c0_87 = arith.constant 0 : index
      %183 = vector.load %arg2[%c0_85, %c0_86, %c0_87] : memref<1x8x32xf32, #tpu.memory_space<vmem>>, vector<1x8x32xf32>
      %184 = vector.shape_cast %183 : vector<1x8x32xf32> to vector<8x32xf32>
      %c0_88 = arith.constant 0 : index
      %c0_89 = arith.constant 0 : index
      %c0_90 = arith.constant 0 : index
      %185 = vector.load %arg15[%c0_88, %c0_89, %c0_90] : memref<1x8x32xf32, #tpu.memory_space<vmem>>, vector<1x8x32xf32>
      %186 = vector.shape_cast %185 : vector<1x8x32xf32> to vector<8x32xf32>
      %187 = vector.shape_cast %184 : vector<8x32xf32> to vector<1x8x32xf32>
      tpu.vector_store %arg15[%c0_88, %c0_89, %c0_90], %187 {strides = array<i32>} : memref<1x8x32xf32, #tpu.memory_space<vmem>>, vector<1x8x32xf32>,
    } else {
    }
    %c0 = arith.constant 0 : index
    %c0_1 = arith.constant 0 : index
    %c0_2 = arith.constant 0 : index
    %3 = vector.load %arg15[%c0, %c0_1, %c0_2] : memref<1x8x32xf32, #tpu.memory_space<vmem>>, vector<1x8x32xf32>
    %4 = vector.shape_cast %3 : vector<1x8x32xf32> to vector<8x32xf32>
    %c0_3 = arith.constant 0 : index
    %c0_4 = arith.constant 0 : index
    %c0_5 = arith.constant 0 : index
    %5 = vector.load %arg3[%c0_3, %c0_4, %c0_5] : memref<1x1x32xf32, #tpu.memory_space<vmem>>, vector<1x1x32xf32>
    %6 = vector.shape_cast %5 : vector<1x1x32xf32> to vector<1x32xf32>
    %c0_6 = arith.constant 0 : index
    %c0_7 = arith.constant 0 : index
    %c0_8 = arith.constant 0 : index
    %7 = vector.load %arg4[%c0_6, %c0_7, %c0_8] : memref<1x1x32xf32, #tpu.memory_space<vmem>>, vector<1x1x32xf32>
    %8 = vector.shape_cast %7 : vector<1x1x32xf32> to vector<1x32xf32>
    %cst = arith.constant dense<0.000000e+00> : vector<8xf32>
    %9 = vector.multi_reduction <add>, %4, %cst [1] : vector<8x32xf32> to vector<8xf32>
    %10 = vector.shape_cast %9 : vector<8xf32> to vector<8x1xf32>
    %cst_9 = arith.constant 3.200000e+01 : f32
    %11 = vector.broadcast %cst_9 : f32 to vector<8x1xf32>
    %12 = arith.divf %10, %11 : vector<8x1xf32>
    %13 = vector.broadcast %12 : vector<8x1xf32> to vector<8x32xf32>
    %14 = arith.subf %4, %13 : vector<8x32xf32>
    %15 = arith.mulf %14, %14 : vector<8x32xf32>
    %cst_10 = arith.constant dense<0.000000e+00> : vector<8xf32>
    %16 = vector.multi_reduction <add>, %15, %cst_10 [1] : vector<8x32xf32> to vector<8xf32>
    %17 = vector.shape_cast %16 : vector<8xf32> to vector<8x1xf32>
    %cst_11 = arith.constant 3.200000e+01 : f32
    %18 = vector.broadcast %cst_11 : f32 to vector<8x1xf32>
    %19 = arith.divf %17, %18 : vector<8x1xf32>
    %20 = vector.broadcast %12 : vector<8x1xf32> to vector<8x32xf32>
    %21 = arith.subf %4, %20 : vector<8x32xf32>
    %cst_12 = arith.constant 9.99999974E-6 : f32
    %22 = vector.broadcast %cst_12 : f32 to vector<8x1xf32>
    %23 = arith.addf %19, %22 : vector<8x1xf32>
    %24 = math.rsqrt %23 : vector<8x1xf32>
    %25 = vector.broadcast %24 : vector<8x1xf32> to vector<8x32xf32>
    %26 = arith.mulf %21, %25 : vector<8x32xf32>
    %27 = vector.broadcast %6 : vector<1x32xf32> to vector<8x32xf32>
    %28 = arith.mulf %26, %27 : vector<8x32xf32>
    %29 = vector.broadcast %8 : vector<1x32xf32> to vector<8x32xf32>
    %30 = arith.addf %28, %29 : vector<8x32xf32>
    %31 = arith.truncf %30 : vector<8x32xf32> to vector<8x32xbf16>
    %c0_13 = arith.constant 0 : index
    %c0_14 = arith.constant 0 : index
    %c0_15 = arith.constant 0 : index
    %32 = vector.load %arg5[%c0_13, %c0_14, %c0_15] : memref<1x32x96xbf16, #tpu.memory_space<vmem>>, vector<1x32x96xbf16>
    %33 = vector.shape_cast %32 : vector<1x32x96xbf16> to vector<32x96xbf16>
    %cst_16 = arith.constant dense<0.000000e+00> : vector<8x96xf32>
    %34 = tpu.matmul %31, %33, %cst_16 {dimension_numbers = #tpu.dot_dimension_numbers<[1], [0], [0], [1], [0, 0, 1, 1], [], []>} : vector<8x32xbf16>, vector<32x96xbf16>, vector<8x96xf32> -> vector<8x96xf32>
    %c0_17 = arith.constant 0 : index
    %c0_18 = arith.constant 0 : index
    %c0_19 = arith.constant 0 : index
    %35 = vector.load %arg6[%c0_17, %c0_18, %c0_19] : memref<1x1x96xf32, #tpu.memory_space<vmem>>, vector<1x1x96xf32>
    %36 = vector.shape_cast %35 : vector<1x1x96xf32> to vector<1x96xf32>
    %37 = vector.broadcast %36 : vector<1x96xf32> to vector<8x96xf32>
    %38 = arith.addf %34, %37 : vector<8x96xf32>
    %39 = arith.truncf %38 : vector<8x96xf32> to vector<8x96xbf16>
    %40 = vector.extract_strided_slice %39 {offsets = [0, 0], sizes = [8, 8], strides = [1, 1]} : vector<8x96xbf16> to vector<8x8xbf16>
    %41 = vector.extract_strided_slice %39 {offsets = [0, 32], sizes = [8, 8], strides = [1, 1]} : vector<8x96xbf16> to vector<8x8xbf16>
    %42 = vector.extract_strided_slice %39 {offsets = [0, 64], sizes = [8, 8], strides = [1, 1]} : vector<8x96xbf16> to vector<8x8xbf16>
    %cst_20 = arith.constant dense<0.000000e+00> : vector<8x8xf32>
    %43 = tpu.matmul %40, %41, %cst_20 {dimension_numbers = #tpu.dot_dimension_numbers<[1], [1], [0], [0], [0, 0, 1, 0], [], []>} : vector<8x8xbf16>, vector<8x8xbf16>, vector<8x8xf32> -> vector<8x8xf32>
    %cst_21 = arith.constant 0.353553385 : f32
    %44 = vector.broadcast %cst_21 : f32 to vector<8x8xf32>
    %45 = arith.mulf %43, %44 : vector<8x8xf32>
    %cst_22 = arith.constant dense<0xFF800000> : vector<8xf32>
    %46 = vector.multi_reduction <maximumf>, %45, %cst_22 [1] : vector<8x8xf32> to vector<8xf32>
    %47 = vector.shape_cast %46 : vector<8xf32> to vector<8x1xf32>
    %48 = vector.broadcast %47 : vector<8x1xf32> to vector<8x8xf32>
    %49 = arith.subf %45, %48 : vector<8x8xf32>
    %50 = math.exp %49 : vector<8x8xf32>
    %cst_23 = arith.constant dense<0.000000e+00> : vector<8xf32>
    %51 = vector.multi_reduction <add>, %50, %cst_23 [1] : vector<8x8xf32> to vector<8xf32>
    %52 = vector.shape_cast %51 : vector<8xf32> to vector<8x1xf32>
    %53 = tpu.reciprocal %52 {approx = true} : vector<8x1xf32> -> vector<8x1xf32>
    %54 = vector.broadcast %53 : vector<8x1xf32> to vector<8x8xf32>
    %55 = arith.mulf %50, %54 : vector<8x8xf32>
    %56 = arith.truncf %55 : vector<8x8xf32> to vector<8x8xbf16>
    %cst_24 = arith.constant dense<0.000000e+00> : vector<8x8xf32>
    %57 = tpu.matmul %56, %42, %cst_24 {dimension_numbers = #tpu.dot_dimension_numbers<[1], [0], [0], [1], [0, 0, 1, 1], [], []>} : vector<8x8xbf16>, vector<8x8xbf16>, vector<8x8xf32> -> vector<8x8xf32>
    %58 = arith.truncf %57 : vector<8x8xf32> to vector<8x8xbf16>
    %c0_25 = arith.constant 0 : index
    %c0_26 = arith.constant 0 : index
    %59 = vector.load %arg16[%c0_25, %c0_26] : memref<8x32xbf16, #tpu.memory_space<vmem>>, vector<8x8xbf16>
    tpu.vector_store %arg16[%c0_25, %c0_26], %58 {strides = array<i32>} : memref<8x32xbf16, #tpu.memory_space<vmem>>, vector<8x8xbf16>,
    %60 = vector.extract_strided_slice %39 {offsets = [0, 8], sizes = [8, 8], strides = [1, 1]} : vector<8x96xbf16> to vector<8x8xbf16>
    %61 = vector.extract_strided_slice %39 {offsets = [0, 40], sizes = [8, 8], strides = [1, 1]} : vector<8x96xbf16> to vector<8x8xbf16>
    %62 = vector.extract_strided_slice %39 {offsets = [0, 72], sizes = [8, 8], strides = [1, 1]} : vector<8x96xbf16> to vector<8x8xbf16>
    %cst_27 = arith.constant dense<0.000000e+00> : vector<8x8xf32>
    %63 = tpu.matmul %60, %61, %cst_27 {dimension_numbers = #tpu.dot_dimension_numbers<[1], [1], [0], [0], [0, 0, 1, 0], [], []>} : vector<8x8xbf16>, vector<8x8xbf16>, vector<8x8xf32> -> vector<8x8xf32>
    %cst_28 = arith.constant 0.353553385 : f32
    %64 = vector.broadcast %cst_28 : f32 to vector<8x8xf32>
    %65 = arith.mulf %63, %64 : vector<8x8xf32>
    %cst_29 = arith.constant dense<0xFF800000> : vector<8xf32>
    %66 = vector.multi_reduction <maximumf>, %65, %cst_29 [1] : vector<8x8xf32> to vector<8xf32>
    %67 = vector.shape_cast %66 : vector<8xf32> to vector<8x1xf32>
    %68 = vector.broadcast %67 : vector<8x1xf32> to vector<8x8xf32>
    %69 = arith.subf %65, %68 : vector<8x8xf32>
    %70 = math.exp %69 : vector<8x8xf32>
    %cst_30 = arith.constant dense<0.000000e+00> : vector<8xf32>
    %71 = vector.multi_reduction <add>, %70, %cst_30 [1] : vector<8x8xf32> to vector<8xf32>
    %72 = vector.shape_cast %71 : vector<8xf32> to vector<8x1xf32>
    %73 = tpu.reciprocal %72 {approx = true} : vector<8x1xf32> -> vector<8x1xf32>
    %74 = vector.broadcast %73 : vector<8x1xf32> to vector<8x8xf32>
    %75 = arith.mulf %70, %74 : vector<8x8xf32>
    %76 = arith.truncf %75 : vector<8x8xf32> to vector<8x8xbf16>
    %cst_31 = arith.constant dense<0.000000e+00> : vector<8x8xf32>
    %77 = tpu.matmul %76, %62, %cst_31 {dimension_numbers = #tpu.dot_dimension_numbers<[1], [0], [0], [1], [0, 0, 1, 1], [], []>} : vector<8x8xbf16>, vector<8x8xbf16>, vector<8x8xf32> -> vector<8x8xf32>
    %78 = arith.truncf %77 : vector<8x8xf32> to vector<8x8xbf16>
    %c0_32 = arith.constant 0 : index
    %c8 = arith.constant 8 : index
    %79 = vector.load %arg16[%c0_32, %c8] : memref<8x32xbf16, #tpu.memory_space<vmem>>, vector<8x8xbf16>
    tpu.vector_store %arg16[%c0_32, %c8], %78 {strides = array<i32>} : memref<8x32xbf16, #tpu.memory_space<vmem>>, vector<8x8xbf16>,
    %80 = vector.extract_strided_slice %39 {offsets = [0, 16], sizes = [8, 8], strides = [1, 1]} : vector<8x96xbf16> to vector<8x8xbf16>
    %81 = vector.extract_strided_slice %39 {offsets = [0, 48], sizes = [8, 8], strides = [1, 1]} : vector<8x96xbf16> to vector<8x8xbf16>
    %82 = vector.extract_strided_slice %39 {offsets = [0, 80], sizes = [8, 8], strides = [1, 1]} : vector<8x96xbf16> to vector<8x8xbf16>
    %cst_33 = arith.constant dense<0.000000e+00> : vector<8x8xf32>
    %83 = tpu.matmul %80, %81, %cst_33 {dimension_numbers = #tpu.dot_dimension_numbers<[1], [1], [0], [0], [0, 0, 1, 0], [], []>} : vector<8x8xbf16>, vector<8x8xbf16>, vector<8x8xf32> -> vector<8x8xf32>
    %cst_34 = arith.constant 0.353553385 : f32
    %84 = vector.broadcast %cst_34 : f32 to vector<8x8xf32>
    %85 = arith.mulf %83, %84 : vector<8x8xf32>
    %cst_35 = arith.constant dense<0xFF800000> : vector<8xf32>
    %86 = vector.multi_reduction <maximumf>, %85, %cst_35 [1] : vector<8x8xf32> to vector<8xf32>
    %87 = vector.shape_cast %86 : vector<8xf32> to vector<8x1xf32>
    %88 = vector.broadcast %87 : vector<8x1xf32> to vector<8x8xf32>
    %89 = arith.subf %85, %88 : vector<8x8xf32>
    %90 = math.exp %89 : vector<8x8xf32>
    %cst_36 = arith.constant dense<0.000000e+00> : vector<8xf32>
    %91 = vector.multi_reduction <add>, %90, %cst_36 [1] : vector<8x8xf32> to vector<8xf32>
    %92 = vector.shape_cast %91 : vector<8xf32> to vector<8x1xf32>
    %93 = tpu.reciprocal %92 {approx = true} : vector<8x1xf32> -> vector<8x1xf32>
    %94 = vector.broadcast %93 : vector<8x1xf32> to vector<8x8xf32>
    %95 = arith.mulf %90, %94 : vector<8x8xf32>
    %96 = arith.truncf %95 : vector<8x8xf32> to vector<8x8xbf16>
    %cst_37 = arith.constant dense<0.000000e+00> : vector<8x8xf32>
    %97 = tpu.matmul %96, %82, %cst_37 {dimension_numbers = #tpu.dot_dimension_numbers<[1], [0], [0], [1], [0, 0, 1, 1], [], []>} : vector<8x8xbf16>, vector<8x8xbf16>, vector<8x8xf32> -> vector<8x8xf32>
    %98 = arith.truncf %97 : vector<8x8xf32> to vector<8x8xbf16>
    %c0_38 = arith.constant 0 : index
    %c16 = arith.constant 16 : index
    %99 = vector.load %arg16[%c0_38, %c16] : memref<8x32xbf16, #tpu.memory_space<vmem>>, vector<8x8xbf16>
    tpu.vector_store %arg16[%c0_38, %c16], %98 {strides = array<i32>} : memref<8x32xbf16, #tpu.memory_space<vmem>>, vector<8x8xbf16>,
    %100 = vector.extract_strided_slice %39 {offsets = [0, 24], sizes = [8, 8], strides = [1, 1]} : vector<8x96xbf16> to vector<8x8xbf16>
    %101 = vector.extract_strided_slice %39 {offsets = [0, 56], sizes = [8, 8], strides = [1, 1]} : vector<8x96xbf16> to vector<8x8xbf16>
    %102 = vector.extract_strided_slice %39 {offsets = [0, 88], sizes = [8, 8], strides = [1, 1]} : vector<8x96xbf16> to vector<8x8xbf16>
    %cst_39 = arith.constant dense<0.000000e+00> : vector<8x8xf32>
    %103 = tpu.matmul %100, %101, %cst_39 {dimension_numbers = #tpu.dot_dimension_numbers<[1], [1], [0], [0], [0, 0, 1, 0], [], []>} : vector<8x8xbf16>, vector<8x8xbf16>, vector<8x8xf32> -> vector<8x8xf32>
    %cst_40 = arith.constant 0.353553385 : f32
    %104 = vector.broadcast %cst_40 : f32 to vector<8x8xf32>
    %105 = arith.mulf %103, %104 : vector<8x8xf32>
    %cst_41 = arith.constant dense<0xFF800000> : vector<8xf32>
    %106 = vector.multi_reduction <maximumf>, %105, %cst_41 [1] : vector<8x8xf32> to vector<8xf32>
    %107 = vector.shape_cast %106 : vector<8xf32> to vector<8x1xf32>
    %108 = vector.broadcast %107 : vector<8x1xf32> to vector<8x8xf32>
    %109 = arith.subf %105, %108 : vector<8x8xf32>
    %110 = math.exp %109 : vector<8x8xf32>
    %cst_42 = arith.constant dense<0.000000e+00> : vector<8xf32>
    %111 = vector.multi_reduction <add>, %110, %cst_42 [1] : vector<8x8xf32> to vector<8xf32>
    %112 = vector.shape_cast %111 : vector<8xf32> to vector<8x1xf32>
    %113 = tpu.reciprocal %112 {approx = true} : vector<8x1xf32> -> vector<8x1xf32>
    %114 = vector.broadcast %113 : vector<8x1xf32> to vector<8x8xf32>
    %115 = arith.mulf %110, %114 : vector<8x8xf32>
    %116 = arith.truncf %115 : vector<8x8xf32> to vector<8x8xbf16>
    %cst_43 = arith.constant dense<0.000000e+00> : vector<8x8xf32>
    %117 = tpu.matmul %116, %102, %cst_43 {dimension_numbers = #tpu.dot_dimension_numbers<[1], [0], [0], [1], [0, 0, 1, 1], [], []>} : vector<8x8xbf16>, vector<8x8xbf16>, vector<8x8xf32> -> vector<8x8xf32>
    %118 = arith.truncf %117 : vector<8x8xf32> to vector<8x8xbf16>
    %c0_44 = arith.constant 0 : index
    %c24 = arith.constant 24 : index
    %119 = vector.load %arg16[%c0_44, %c24] : memref<8x32xbf16, #tpu.memory_space<vmem>>, vector<8x8xbf16>
    tpu.vector_store %arg16[%c0_44, %c24], %118 {strides = array<i32>} : memref<8x32xbf16, #tpu.memory_space<vmem>>, vector<8x8xbf16>,
    %c0_45 = arith.constant 0 : index
    %c0_46 = arith.constant 0 : index
    %120 = vector.load %arg16[%c0_45, %c0_46] : memref<8x32xbf16, #tpu.memory_space<vmem>>, vector<8x32xbf16>
    %c0_47 = arith.constant 0 : index
    %c0_48 = arith.constant 0 : index
    %c0_49 = arith.constant 0 : index
    %121 = vector.load %arg7[%c0_47, %c0_48, %c0_49] : memref<1x32x32xbf16, #tpu.memory_space<vmem>>, vector<1x32x32xbf16>
    %122 = vector.shape_cast %121 : vector<1x32x32xbf16> to vector<32x32xbf16>
    %cst_50 = arith.constant dense<0.000000e+00> : vector<8x32xf32>
    %123 = tpu.matmul %120, %122, %cst_50 {dimension_numbers = #tpu.dot_dimension_numbers<[1], [0], [0], [1], [0, 0, 1, 1], [], []>} : vector<8x32xbf16>, vector<32x32xbf16>, vector<8x32xf32> -> vector<8x32xf32>
    %c0_51 = arith.constant 0 : index
    %c0_52 = arith.constant 0 : index
    %c0_53 = arith.constant 0 : index
    %124 = vector.load %arg8[%c0_51, %c0_52, %c0_53] : memref<1x1x32xf32, #tpu.memory_space<vmem>>, vector<1x1x32xf32>
    %125 = vector.shape_cast %124 : vector<1x1x32xf32> to vector<1x32xf32>
    %126 = vector.broadcast %125 : vector<1x32xf32> to vector<8x32xf32>
    %127 = arith.addf %123, %126 : vector<8x32xf32>
    %128 = arith.addf %4, %127 : vector<8x32xf32>
    %c0_54 = arith.constant 0 : index
    %c0_55 = arith.constant 0 : index
    %c0_56 = arith.constant 0 : index
    %129 = vector.load %arg9[%c0_54, %c0_55, %c0_56] : memref<1x1x32xf32, #tpu.memory_space<vmem>>, vector<1x1x32xf32>
    %130 = vector.shape_cast %129 : vector<1x1x32xf32> to vector<1x32xf32>
    %c0_57 = arith.constant 0 : index
    %c0_58 = arith.constant 0 : index
    %c0_59 = arith.constant 0 : index
    %131 = vector.load %arg10[%c0_57, %c0_58, %c0_59] : memref<1x1x32xf32, #tpu.memory_space<vmem>>, vector<1x1x32xf32>
    %132 = vector.shape_cast %131 : vector<1x1x32xf32> to vector<1x32xf32>
    %cst_60 = arith.constant dense<0.000000e+00> : vector<8xf32>
    %133 = vector.multi_reduction <add>, %128, %cst_60 [1] : vector<8x32xf32> to vector<8xf32>
    %134 = vector.shape_cast %133 : vector<8xf32> to vector<8x1xf32>
    %cst_61 = arith.constant 3.200000e+01 : f32
    %135 = vector.broadcast %cst_61 : f32 to vector<8x1xf32>
    %136 = arith.divf %134, %135 : vector<8x1xf32>
    %137 = vector.broadcast %136 : vector<8x1xf32> to vector<8x32xf32>
    %138 = arith.subf %128, %137 : vector<8x32xf32>
    %139 = arith.mulf %138, %138 : vector<8x32xf32>
    %cst_62 = arith.constant dense<0.000000e+00> : vector<8xf32>
    %140 = vector.multi_reduction <add>, %139, %cst_62 [1] : vector<8x32xf32> to vector<8xf32>
    %141 = vector.shape_cast %140 : vector<8xf32> to vector<8x1xf32>
    %cst_63 = arith.constant 3.200000e+01 : f32
    %142 = vector.broadcast %cst_63 : f32 to vector<8x1xf32>
    %143 = arith.divf %141, %142 : vector<8x1xf32>
    %144 = vector.broadcast %136 : vector<8x1xf32> to vector<8x32xf32>
    %145 = arith.subf %128, %144 : vector<8x32xf32>
    %cst_64 = arith.constant 9.99999974E-6 : f32
    %146 = vector.broadcast %cst_64 : f32 to vector<8x1xf32>
    %147 = arith.addf %143, %146 : vector<8x1xf32>
    %148 = math.rsqrt %147 : vector<8x1xf32>
    %149 = vector.broadcast %148 : vector<8x1xf32> to vector<8x32xf32>
    %150 = arith.mulf %145, %149 : vector<8x32xf32>
    %151 = vector.broadcast %130 : vector<1x32xf32> to vector<8x32xf32>
    %152 = arith.mulf %150, %151 : vector<8x32xf32>
    %153 = vector.broadcast %132 : vector<1x32xf32> to vector<8x32xf32>
    %154 = arith.addf %152, %153 : vector<8x32xf32>
    %155 = arith.truncf %154 : vector<8x32xf32> to vector<8x32xbf16>
    %c0_65 = arith.constant 0 : index
    %c0_66 = arith.constant 0 : index
    %c0_67 = arith.constant 0 : index
    %156 = vector.load %arg11[%c0_65, %c0_66, %c0_67] : memref<1x32x128xbf16, #tpu.memory_space<vmem>>, vector<1x32x128xbf16>
    %157 = vector.shape_cast %156 : vector<1x32x128xbf16> to vector<32x128xbf16>
    %cst_68 = arith.constant dense<0.000000e+00> : vector<8x128xf32>
    %158 = tpu.matmul %155, %157, %cst_68 {dimension_numbers = #tpu.dot_dimension_numbers<[1], [0], [0], [1], [0, 0, 1, 1], [], []>} : vector<8x32xbf16>, vector<32x128xbf16>, vector<8x128xf32> -> vector<8x128xf32>
    %c0_69 = arith.constant 0 : index
    %c0_70 = arith.constant 0 : index
    %c0_71 = arith.constant 0 : index
    %159 = vector.load %arg12[%c0_69, %c0_70, %c0_71] : memref<1x1x128xf32, #tpu.memory_space<vmem>>, vector<1x1x128xf32>
    %160 = vector.shape_cast %159 : vector<1x1x128xf32> to vector<1x128xf32>
    %161 = vector.broadcast %160 : vector<1x128xf32> to vector<8x128xf32>
    %162 = arith.addf %158, %161 : vector<8x128xf32>
    %cst_72 = arith.constant 5.000000e-01 : f32
    %163 = vector.broadcast %cst_72 : f32 to vector<8x128xf32>
    %164 = arith.mulf %163, %162 : vector<8x128xf32>
    %cst_73 = arith.constant 0.707106769 : f32
    %165 = vector.broadcast %cst_73 : f32 to vector<8x128xf32>
    %166 = arith.mulf %162, %165 : vector<8x128xf32>
    %167 = math.erf %166 : vector<8x128xf32>
    %cst_74 = arith.constant 1.000000e+00 : f32
    %168 = vector.broadcast %cst_74 : f32 to vector<8x128xf32>
    %169 = arith.addf %168, %167 : vector<8x128xf32>
    %170 = arith.mulf %164, %169 : vector<8x128xf32>
    %171 = arith.truncf %170 : vector<8x128xf32> to vector<8x128xbf16>
    %c0_75 = arith.constant 0 : index
    %c0_76 = arith.constant 0 : index
    %c0_77 = arith.constant 0 : index
    %172 = vector.load %arg13[%c0_75, %c0_76, %c0_77] : memref<1x128x32xbf16, #tpu.memory_space<vmem>>, vector<1x128x32xbf16>
    %173 = vector.shape_cast %172 : vector<1x128x32xbf16> to vector<128x32xbf16>
    %cst_78 = arith.constant dense<0.000000e+00> : vector<8x32xf32>
    %174 = tpu.matmul %171, %173, %cst_78 {dimension_numbers = #tpu.dot_dimension_numbers<[1], [0], [0], [1], [0, 0, 1, 1], [], []>} : vector<8x128xbf16>, vector<128x32xbf16>, vector<8x32xf32> -> vector<8x32xf32>
    %c0_79 = arith.constant 0 : index
    %c0_80 = arith.constant 0 : index
    %c0_81 = arith.constant 0 : index
    %175 = vector.load %arg14[%c0_79, %c0_80, %c0_81] : memref<1x1x32xf32, #tpu.memory_space<vmem>>, vector<1x1x32xf32>
    %176 = vector.shape_cast %175 : vector<1x1x32xf32> to vector<1x32xf32>
    %177 = vector.broadcast %176 : vector<1x32xf32> to vector<8x32xf32>
    %178 = arith.addf %174, %177 : vector<8x32xf32>
    %179 = arith.addf %128, %178 : vector<8x32xf32>
    %c0_82 = arith.constant 0 : index
    %c0_83 = arith.constant 0 : index
    %c0_84 = arith.constant 0 : index
    %180 = vector.load %arg15[%c0_82, %c0_83, %c0_84] : memref<1x8x32xf32, #tpu.memory_space<vmem>>, vector<1x8x32xf32>
    %181 = vector.shape_cast %180 : vector<1x8x32xf32> to vector<8x32xf32>
    %182 = vector.shape_cast %179 : vector<8x32xf32> to vector<1x8x32xf32>
    tpu.vector_store %arg15[%c0_82, %c0_83, %c0_84], %182 {strides = array<i32>} : memref<1x8x32xf32, #tpu.memory_space<vmem>>, vector<1x8x32xf32>,
    return
  }
  func.func @transform_0(%arg0: i32, %arg1: i32) -> (i32, i32, i32) {
    %c0_i32 = arith.constant 0 : i32
    %c0_i32_0 = arith.constant 0 : i32
    %c0_i32_1 = arith.constant 0 : i32
    return %arg0, %c0_i32, %c0_i32_0 : i32, i32, i32
  }
  func.func @transform_1(%arg0: i32, %arg1: i32) -> (i32, i32, i32) {
    %c0_i32 = arith.constant 0 : i32
    %c0_i32_0 = arith.constant 0 : i32
    %c0_i32_1 = arith.constant 0 : i32
    return %arg1, %c0_i32, %c0_i32_0 : i32, i32, i32
  }
  func.func @transform_2(%arg0: i32, %arg1: i32) -> (i32, i32, i32) {
    %c0_i32 = arith.constant 0 : i32
    %c0_i32_0 = arith.constant 0 : i32
    %c0_i32_1 = arith.constant 0 : i32
    return %arg1, %c0_i32, %c0_i32_0 : i32, i32, i32
  }
  func.func @transform_3(%arg0: i32, %arg1: i32) -> (i32, i32, i32) {
    %c0_i32 = arith.constant 0 : i32
    %c0_i32_0 = arith.constant 0 : i32
    %c0_i32_1 = arith.constant 0 : i32
    return %arg1, %c0_i32, %c0_i32_0 : i32, i32, i32
  }
  func.func @transform_4(%arg0: i32, %arg1: i32) -> (i32, i32, i32) {
    %c0_i32 = arith.constant 0 : i32
    %c0_i32_0 = arith.constant 0 : i32
    %c0_i32_1 = arith.constant 0 : i32
    return %arg1, %c0_i32, %c0_i32_0 : i32, i32, i32
  }
  func.func @transform_5(%arg0: i32, %arg1: i32) -> (i32, i32, i32) {
    %c0_i32 = arith.constant 0 : i32
    %c0_i32_0 = arith.constant 0 : i32
    %c0_i32_1 = arith.constant 0 : i32
    return %arg1, %c0_i32, %c0_i32_0 : i32, i32, i32
  }
  func.func @transform_6(%arg0: i32, %arg1: i32) -> (i32, i32, i32) {
    %c0_i32 = arith.constant 0 : i32
    %c0_i32_0 = arith.constant 0 : i32
    %c0_i32_1 = arith.constant 0 : i32
    return %arg1, %c0_i32, %c0_i32_0 : i32, i32, i32
  }
  func.func @transform_7(%arg0: i32, %arg1: i32) -> (i32, i32, i32) {
    %c0_i32 = arith.constant 0 : i32
    %c0_i32_0 = arith.constant 0 : i32
    %c0_i32_1 = arith.constant 0 : i32
    return %arg1, %c0_i32, %c0_i32_0 : i32, i32, i32
  }
  func.func @transform_8(%arg0: i32, %arg1: i32) -> (i32, i32, i32) {
    %c0_i32 = arith.constant 0 : i32
    %c0_i32_0 = arith.constant 0 : i32
    %c0_i32_1 = arith.constant 0 : i32
    return %arg1, %c0_i32, %c0_i32_0 : i32, i32, i32
  }
  func.func @transform_9(%arg0: i32, %arg1: i32) -> (i32, i32, i32) {
    %c0_i32 = arith.constant 0 : i32
    %c0_i32_0 = arith.constant 0 : i32
    %c0_i32_1 = arith.constant 0 : i32
    return %arg1, %c0_i32, %c0_i32_0 : i32, i32, i32
  }
  func.func @transform_10(%arg0: i32, %arg1: i32) -> (i32, i32, i32) {
    %c0_i32 = arith.constant 0 : i32
    %c0_i32_0 = arith.constant 0 : i32
    %c0_i32_1 = arith.constant 0 : i32
    return %arg1, %c0_i32, %c0_i32_0 : i32, i32, i32
  }
  func.func @transform_11(%arg0: i32, %arg1: i32) -> (i32, i32, i32) {
    %c0_i32 = arith.constant 0 : i32
    %c0_i32_0 = arith.constant 0 : i32
    %c0_i32_1 = arith.constant 0 : i32
    return %arg1, %c0_i32, %c0_i32_0 : i32, i32, i32
  }
  func.func @transform_12(%arg0: i32, %arg1: i32) -> (i32, i32, i32) {
    %c0_i32 = arith.constant 0 : i32
    %c0_i32_0 = arith.constant 0 : i32
    %c0_i32_1 = arith.constant 0 : i32
    return %arg1, %c0_i32, %c0_i32_0 : i32, i32, i32
  }
  func.func @transform_13(%arg0: i32, %arg1: i32) -> (i32, i32, i32) {
    %c0_i32 = arith.constant 0 : i32
    %c0_i32_0 = arith.constant 0 : i32
    %c0_i32_1 = arith.constant 0 : i32
    return %arg0, %c0_i32, %c0_i32_0 : i32, i32, i32
  }
}

</mosaic_0001>

<bundles_post_ra>
// kernel: tpu_custom_call.1
= control target key start
LH: loop header
LB: loop body
LE: loop exit
PB: predicated region body
PF: predicated region fallthrough
CT: control target
= control target key end

     0   :  { %s2129_s0 = inlined_call_operand.vmem [shape: f32[2,8,32], index: 0, kind: input, shape index: {}]   ;;  %s2130_s1 = inlined_call_operand.vmem [shape: f32[2,1,32], index: 1, kind: input, shape index: {}]   ;;  %s2131_s2 = inlined_call_operand.vmem [shape: f32[2,1,32], index: 2, kind: input, shape index: {}]   ;;  %s2132_s3 = inlined_call_operand.vmem [shape: bf16[2,32,96], index: 3, kind: input, shape index: {}]   ;;  %s2133_s4 = inlined_call_operand.vmem [shape: f32[2,1,96], index: 4, kind: input, shape index: {}]   ;;  %s2134_s5 = inlined_call_operand.vmem [shape: bf16[2,32,32], index: 5, kind: input, shape index: {}]   ;;  %s2135_s6 = inlined_call_operand.vmem [shape: f32[2,1,32], index: 6, kind: input, shape index: {}]   ;;  %s2136_s7 = inlined_call_operand.vmem [shape: f32[2,1,32], index: 7, kind: input, shape index: {}]   ;;  %s2137_s8 = inlined_call_operand.vmem [shape: f32[2,1,32], index: 8, kind: input, shape index: {}]   ;;  %s2138_s9 = inlined_call_operand.vmem [shape: bf16[2,32,128], index: 9, kind: input, shape index: {}]   ;;  %s2139_s10 = inlined_call_operand.vmem [shape: f32[2,1,128], index: 10, kind: input, shape index: {}]   ;;  %s2140_s11 = inlined_call_operand.vmem [shape: bf16[2,128,32], index: 11, kind: input, shape index: {}]   ;;  %s2141_s12 = inlined_call_operand.vmem [shape: f32[2,1,32], index: 12, kind: input, shape index: {}]   ;;  %s2142_s13 = inlined_call_operand.hbm [shape: f32[2,8,32], index: 13, kind: output, shape index: {}]  }
   0x1   :  { %2158 = sst [smem:[#allocation19_spill]] %s2129_s0 }
   0x2   :  { %2159 = sst [smem:[#allocation20_spill]] %s2132_s3 }
   0x3   :  { %2160 = sst [smem:[#allocation21_spill]] %s2134_s5 }
   0x4   :  { %2161 = sst [smem:[#allocation22_spill]] %s2136_s7 }
   0x5   :  { %2162 = sst [smem:[#allocation23_spill]] %s2140_s11 }
   0x6   :  { %2163 = sst [smem:[#allocation24_spill]] %s2142_s13 }
   0x7   :  { %18 = vsyncpa [#allocation4], 0 }
   0x8   :  { %20 = vsyncpa [#allocation4 + $0x1], 0  ;;  %s1828_s25 = smov 0   ;;  %s1830_s26 = smov 0  }
   0x9   :  { %s1832_s27 = smov 0   ;;  %s1834_s28 = smov 0  }
   0xa   :  { %s1836_s29 = smov 0   ;;  %s1838_s30 = smov 0  }
   0xb   :  { %s1840_s14 = smov 0   ;;  %s1842_s15 = smov 0  }
   0xc LB: > { %2164 = sst [smem:[#allocation6_spill]] %s1713_s25  ;;  %s1423_s16 = sadd.s32 4294967295, %s1741_s15   ;;  %s1741_s15 = sphi %s1842_s15, %s26_s15   ;;  %s1737_s14 = sphi %s1840_s14, %s2206_s14   ;;  %s1733_s30 = sphi %s1838_s30, %s2205_s30   ;;  %s1729_s29 = sphi %s1836_s29, %s2204_s29   ;;  %s1725_s28 = sphi %s1834_s28, %s2203_s28   ;;  %s1721_s27 = sphi %s1832_s27, %s2202_s27   ;;  %s1717_s26 = sphi %s1830_s26, %s2201_s26   ;;  %s1713_s25 = sphi %s1828_s25, %s2200_s25  }
   0xd   : > { %2165 = sst [smem:[#allocation7_spill]] %s1717_s26  ;;  %s1424_s17 = sadd.s32 4294967294, %s1741_s15  }
   0xe   : > { %2166 = sst [smem:[#allocation8_spill]] %s1721_s27  ;;  %s35_s18 = sadd.s32 1, %s1733_s30 }
   0xf   : > { %2167 = sst [smem:[#allocation9_spill]] %s1725_s28  ;;  %p36_p0 = scmp.ge.s32.totalorder %s35_s18, 2 }
  0x10   : > { %2168 = sst [smem:[#allocation10_spill]] %s1729_s29  ;;  %s38_s19 = sadd.s32 1, %s1737_s14 }
  0x11   : > { %2169 = sst [smem:[#allocation11_spill]] %s1733_s30  ;;  %p393_p1 = scmp.ne.s32.totalorder %s1721_s27, %s1717_s26 }
  0x12   : > { %2170 = sst [smem:[#allocation12_spill]] %s1737_s14  ;;  %p394_p2 = scmp.eq.s32.totalorder %s1423_s16, 3 }
  0x13   : > { %2171 = sst [smem:[#allocation13_spill]] %s1741_s15  ;;  %s2208_s18 = smov (%p36_p0, %s35_s18), 0 }
  0x14   : > { %2172 = sst [smem:[#allocation14_spill]] %s2208_s18  ;;  %s2210_s19 = smov (!%p36_p0, %s38_s19), %s1737_s14 }
  0x15   : > { %p1877_p3 = por %p394_p2, %p393_p1  ;;  %p399_p4 = scmp.ne.s32.totalorder %s1717_s26, %s1713_s25 }
  0x16   : > { %p40_p5 = scmp.ge.s32.totalorder %s2210_s19, 2  ;;  %p400_p6 = scmp.eq.s32.totalorder %s1424_s17, 3 }
  0x17   : > { %s2173_s20 = scalar_select %p1877_p3, 1, 0 }
  0x18   : > { %p1427_p7 = scmp.ge.s32.totalorder %s1741_s15, 1  ;;  %p505_p8 = scmp.lt.s32.totalorder %s1741_s15, 5 }
  0x19   : > { %2174 = sst [smem:[#allocation15_spill]] %s2173_s20  ;;  %s2212_s19 = smov (%p40_p5, %s2210_s19), 0 }
  0x1a   : > { %2175 = sst [smem:[#allocation16_spill]] %s2212_s19  ;;  %p1887_p9 = por %p400_p6, %p399_p4 }
  0x1b   : > { %p506_p10 = pnand %p1427_p7, %p505_p8  ;;  %s380_s22 = ssub.s32 %s1737_s14, %s2212_s19 }
  0x1c   : > { %s2176_s21 = scalar_select %p1887_p9, 1, 0 }
  0x1d   : > { %s383_s23 = sadd.s32 1, %s1721_s27  ;;  %p381_p11 = scmp.eq.s32.totalorder %s380_s22, 0 }
  0x1e   : > { %2177 = sst [smem:[#allocation17_spill]] %s2176_s21  ;;  %509 = sbr.rel (%p506_p10) target bundleno = 2403 (0x963), region = 72 }
  0x1f   : > { %s1895_s24 = scalar_select %p381_p11, %s1721_s27, %s383_s23  }
  0x20   : > { %s2146_s16 = sand.u32 (!%p506_p10), 1, %s1717_s26   ;;  %p592_p12 = scmp.lt.s32.totalorder (!%p506_p10), %s1729_s29, 1 }
  0x21   : > { %2178 = sst [smem:[#allocation18_spill]] %s1895_s24  ;;  %s1428_s17 = sshll.u32 (!%p506_p10), %s2146_s16, 3 }
  0x22   : > { %p596_p13 = scmp.lt.s32.totalorder (!%p506_p10), %s1725_s28, 1  ;;  %s2179_s0 = sld [smem:[#allocation19_spill]] (!%p506_p10) }
  0x23   : > { %s593_s18 = scalar_select %p592_p12, %s1729_s29, 1 }
  0x24   : > { %s1904_s30 = scalar_select %p596_p13, %s1725_s28, 1 }
  0x25   : > { %s1429_s22 = sshll.u32 %s593_s18, 3  ;;  %s2180_s3 = sld [smem:[#allocation20_spill]] }
  0x26   : > { %s1511_s13 = sshll.u32 %s1904_s30, 4  ;;  %s2181_s5 = sld [smem:[#allocation21_spill]] }
  0x27   : > { %s1947_s18 = scalar_lea.vmem %s2138_s9, %s1511_s13  ;;  %s631_s11 = scalar_lea.vmem %s2139_s10, %s1904_s30 }
  0x28   : > { %s595_s14 = scalar_lea.vmem %s2179_s0, %s1429_s22  ;;  %s623_s0 = scalar_lea.vmem %s2137_s8, %s1904_s30 }
  0x29   : > { %s639_s25 = scalar_lea.vmem %s2141_s12, %s1904_s30  ;;  %s2183_s27 = sld [smem:[#allocation23_spill]] }
  0x2a   : > { %s1963_s26 = scalar_lea.vmem [#allocation3], %s1428_s17  ;;  %s2184_s20 = sld [smem:[#allocation9_spill]] }
  0x2b   : > { %s1921_s29 = scalar_lea.vmem %s2180_s3, %s1511_s13 }
  0x2c   : > { %s1930_s23 = scalar_lea.vmem %s2181_s5, %s1511_s13  ;;  %s1514_s5 = sshll.u32 %s1904_s30, 6 }
  0x2f   : > { %s1961_s7 = scalar_lea.vmem %s2183_s27, %s1514_s5 }
  0x30   : > { %p1438_p0 = scmp.ne.s32.totalorder %s2184_s20, 0 }
  0x32   : > { %644 = sbr.rel (%p1438_p0) target bundleno = 57 (0x39), region = 76 }
  0x37   : > { %v645_v0 = vld [vmem:[%s595_s14] sm:$0xff]  ;;  %vm646_vm0 = vcmask 261120  }
  0x38   : > { %647 = vst.msk [vmem:[%s1963_s26] sm:$0xff] %vm646_vm0, %v645_v0 }
  0x39 PF: > { %vm651_vm1 = vcmask 261120   ;;  %v1743_v3 = vmov 32.0   ;;  %v1516_v15 = vld [vmem:[%s1921_s29 + $0x8] sm:$0xff]  ;;  %v1515_v16 = vld [vmem:[%s1921_s29] sm:$0xff]  ;;  %s2185_s13 = scalar_lea.vmem %s2130_s1, %s1904_s30  ;;  %s2186_s14 = scalar_lea.vmem %s2131_s2, %s1904_s30  ;;  %vm770_vm6 = vcmask 1043456   ;;  %vm732_vm7 = vcmask 64512  }
  0x3a   : > { %1623 = vrcp.f32 %v1743_v3  ;;  %719 = vmatpush.bf16.msra.mxu0 %v1516_v15  ;;  %v1615_v26 = vld [vmem:[%s2185_s13] ss:$0 sm:$0xff]  ;;  %s2187_s19 = scalar_lea.vmem %s2133_s4, %s1904_s30  ;;  %s1744_s22 = smov 88   ;;  %vm788_vm8 = vcmask 60416   ;;  %vm852_vm9 = vcmask 126016   ;;  %vm916_vm10 = vcmask 191616  }
  0x3b   : > { %v1616_v29 = vld [vmem:[%s2186_s14] ss:$0 sm:$0xff]  ;;  %s1745_s24 = smov 64   ;;  %s1746_s16 = smov 96   ;;  %vm980_vm11 = vcmask 257216  }
  0x3c   : > { %v1617_v33 = vld [vmem:[%s2187_s19] ss:$0 sm:$0xff]  ;;  %s1747_s15 = smov 72   ;;  %s1748_s21 = smov 80  }
  0x3d   : > { %s1749_s20 = smov 120   ;;  %s1750_s3 = smov 104  }
  0x3e   : > { %720 = vmatpush.bf16.msra.mxu0 %v1515_v16  ;;  %s1751_s5 = smov 112   ;;  %s1752_s13 = smov 40  }
  0x3f   : > { %v1968_v1 = vld [vmem:[%s1963_s26] sm:$0xff]  ;;  %s1753_s27 = smov 48   ;;  %s1754_s29 = smov 56  }
  0x40   : > { %v652_v2 = vsel %vm651_vm1, %v1968_v1, 0.0  ;;  %v1624_v4 = vpop.eup %1623  ;;  %s1755_s14 = smov 16   ;;  %s1756_s17 = smov 8  }
  0x41   : > { %653 = vadd.xlane.f32.xlu0 %v652_v2  ;;  %v656_v5 = vmul.f32 32.0, %v1624_v4  ;;  %vm660_vm2 = vweird.f32 %v1624_v4  ;;  %s1757_s28 = smov 24  }
  0x43   : > { %v657_v6 = vsub.f32 1.0, %v656_v5 }
  0x45   : > { %v658_v7 = vmul.f32 %v1624_v4, %v657_v6 }
  0x47   : > { %v659_v8 = vadd.f32 %v1624_v4, %v658_v7 }
  0x49   : > { %v1972_v9 = vsel %vm660_vm2, %v1624_v4, %v659_v8 }
  0xb4   : > { %v654_v10 = vpop.xlane.xlu0 %653 }
  0xb5   : > { %v662_v11 = vmul.f32 %v1972_v9, %v654_v10 }
  0xb7   : > { %v663_v12 = vsub.f32 %v1968_v1, %v662_v11 }
  0xb9   : > { %v664_v13 = vmul.f32 %v663_v12, %v663_v12 }
  0xbb   : > { %v665_v14 = vsel %vm651_vm1, %v664_v13, 0.0 }
  0xbc   : > { %666 = vadd.xlane.f32.xlu0 %v665_v14 }
 0x12f   : > { %v667_v17 = vpop.xlane.xlu0 %666 }
 0x130   : > { %v668_v18 = vmul.f32 %v667_v17, %v1972_v9 }
 0x132   : > { %v669_v19 = vadd.f32 1e-05, %v668_v18 }
 0x134   : > { %1625 = vrsqrt.f32 %v669_v19  ;;  %vm676_vm4 = vweird.f32 %v669_v19 }
 0x13a   : > { %v1626_v20 = vpop.eup %1625 }
 0x13b   : > { %v671_v21 = vmul.f32 %v1626_v20, %v669_v19  ;;  %vm677_vm3 = vweird.f32 %v1626_v20 }
 0x13c   : > { %vm678_vm5 = vmor %vm676_vm4, %vm677_vm3 }
 0x13d   : > { %v672_v22 = vmul.f32 %v1626_v20, %v671_v21 }
 0x13f   : > { %v673_v23 = vmul.f32 0.5, %v672_v22 }
 0x141   : > { %v674_v24 = vsub.f32 1.5, %v673_v23 }
 0x143   : > { %v675_v25 = vmul.f32 %v1626_v20, %v674_v24 }
 0x145   : > { %v679_v27 = vsel %vm678_vm5, %v1626_v20, %v675_v25 }
 0x146   : > { %v680_v28 = vmul.f32 %v679_v27, %v663_v12 }
 0x148   : > { %v684_v30 = vmul.f32 %v1615_v26, %v680_v28 }
 0x14a   : > { %v688_v31 = vadd.f32 %v1616_v29, %v684_v30 }
 0x14c   : > { %v689_v32 = vpack.c.bf16 %v688_v31, %v688_v31 }
 0x14e   : > { %1447 = vmatmul.msk.bf16.vlgmr.msra.gmra.mxu0 %vm651_vm1, %v689_v32 }
 0x1cb   : > { %v722_v34 = vpop.f32.mrf.mxu0 }
 0x1cc   : > { %v723_v35 = vadd.f32 %v1617_v33, %v722_v34 }
 0x1ce   : > { %v726_v36 = vpack.c.bf16 %v723_v35, %v723_v35 }
 0x1d0   : > { %v728_v37 = vunpack.c.l.b16 %v726_v36 }
 0x1d2   : > { %v1996_v38 = vpack.c.b16 %v728_v37, %v728_v37 }
 0x1d3   : > { %v724_v39 = vpop.f32.mrf.mxu0 }
 0x1d4   : > { %792 = vrot.lane.b32.xlu0 %v1996_v38, %s1744_s22  ;;  %765 = vrot.lane.b32.xlu2 %v1996_v38, %s1745_s24  ;;  %s2188_s24 = scalar_lea.vmem %s2135_s6, %s1904_s30 }
 0x1d5   : > { %730 = vrot.lane.b32.xlu1 %v1996_v38, %s1746_s16  ;;  %s2189_s16 = sld [smem:[#allocation22_spill]] }
 0x1dc   : > { %920 = vrot.lane.b32.xlu0 %v1996_v38, %s1747_s15  ;;  %s2190_s15 = scalar_lea.vmem %s2189_s16, %s1904_s30 }
 0x1e4   : > { %856 = vrot.lane.b32.xlu0 %v1996_v38, %s1748_s21 }
 0x22e   : > { %v766_v40 = vpop.permute.xlu2 %765 }
 0x22f   : > { %v772_v41 = vsel %vm770_vm6, %v766_v40, 0 }
 0x230   : > { %781 = vmatpush.bf16.msra.mxu2 %v772_v41 }
 0x246   : > { %v793_v42 = vpop.permute.xlu0 %792 }
 0x247   : > { %v731_v43 = vpop.permute.xlu1 %730  ;;  %v798_v44 = vsel %vm732_vm7, %v793_v42, 0 }
 0x248   : > { %v737_v45 = vsel %vm732_vm7, %v731_v43, 0  ;;  %807 = vmatpush.bf16.xpose.msrb.mxu2 %v798_v44 }
 0x249   : > { %746 = vmatpush.bf16.xpose.msra.mxu1 %v737_v45 }
 0x24e   : > { %v921_v46 = vpop.permute.xlu0 %920 }
 0x24f   : > { %v926_v47 = vsel %vm732_vm7, %v921_v46, 0 }
 0x250   : > { %1448 = vmatmul.msk.bf16.vlgmr.msra.gmra.mxu1 %vm732_vm7, %v726_v36  ;;  %935 = vmatpush.bf16.xpose.msra.mxu3 %v926_v47 }
 0x256   : > { %v857_v48 = vpop.permute.xlu0 %856 }
 0x257   : > { %v862_v49 = vsel %vm732_vm7, %v857_v48, 0 }
 0x258   : > { %871 = vmatpush.bf16.xpose.msrb.mxu0 %v862_v49 }
 0x2cd   : > { %v748_v50 = vpop.f32.mrf.mxu1 }
 0x2ce   : > { %v752_v51 = vmul.f32 0.35355338, %v748_v50 }
 0x2d0   : > { %v753_v52 = vsel %vm732_vm7, %v752_v51, -inf }
 0x2d1   : > { %754 = vmax.xlane.f32.xlu1 %v753_v52 }
 0x2d5   : > { %v750_v53 = vpop.f32.mrf.mxu1 }
 0x344   : > { %v755_v54 = vpop.xlane.xlu1 %754 }
 0x345   : > { %v756_v55 = vsub.f32 %v752_v51, %v755_v54 }
 0x347   : > { %v757_v56 = vmul.f32 1.442695, %v756_v55 }
 0x349   : > { %1627 = vpow2.f32 %v757_v56 }
 0x34f   : > { %v1628_v57 = vpop.eup %1627 }
 0x350   : > { %v759_v58 = vsel %vm732_vm7, %v1628_v57, 0.0 }
 0x351   : > { %760 = vadd.xlane.f32.xlu2 %v759_v58 }
 0x369   : > { %790 = vrot.lane.b32.xlu2 %v1996_v38, %s1749_s20 }
 0x371   : > { %918 = vrot.lane.b32.xlu2 %v1996_v38, %s1750_s3 }
 0x379   : > { %854 = vrot.lane.b32.xlu2 %v1996_v38, %s1751_s5 }
 0x3c4   : > { %v761_v59 = vpop.xlane.xlu2 %760 }
 0x3c5   : > { %1629 = vrcp.f32 %v761_v59 }
 0x3cb   : > { %v1630_v60 = vpop.eup %1629 }
 0x3cc   : > { %v791_v61 = vpop.permute.xlu2 %790  ;;  %v763_v62 = vmul.f32 %v1630_v60, %v1628_v57 }
 0x3ce   : > { %v764_v63 = vpack.c.bf16 %v763_v62, %v763_v62 }
 0x3d0   : > { %1449 = vmatmul.msk.bf16.vlgmr.msra.gmra.mxu2 %vm732_vm7, %v764_v63 }
 0x3d4   : > { %v919_v0 = vpop.permute.xlu2 %918 }
 0x3d5   : > { %1454 = vmatmul.msk.bf16.vlgmr.msra.gmra.mxu3 %vm732_vm7, %v919_v0  ;;  %v1517_v0 = vld [vmem:[%s1930_s23] sm:$0xff] }
 0x3dc   : > { %v855_v2 = vpop.permute.xlu2 %854 }
 0x3dd   : > { %1452 = vmatmul.msk.bf16.vlgmr.msrb.gmra.mxu0 %vm732_vm7, %v855_v2 }
 0x3e0   : > { %1450 = vmatmul.msk.bf16.vlgmr.msrb.gmra.mxu2 %vm732_vm7, %v791_v61  ;;  %v1518_v61 = vld [vmem:[%s1930_s23 + $0x8] sm:$0xff] }
 0x3e1   : > { %1012 = vmatpush.bf16.msra.mxu0 %v1518_v61 }
 0x3e5   : > { %1013 = vmatpush.bf16.msra.mxu0 %v1517_v0 }
 0x453   : > { %v783_v3 = vpop.f32.mrf.mxu2 }
 0x454   : > { %v787_v4 = vpack.c.bf16 %v783_v3, %v783_v3 }
 0x456   : > { %789 = vst.msk [vmem:[#allocation2] sm:$0xf] %vm788_vm8, %v787_v4  ;;  %v1618_v4 = vld [vmem:[%s2188_s24] ss:$0 sm:$0xff]  ;;  %s1230_s24 = sshll.u32 %s1963_s26, 4  ;;  %s1231_s24 = int_to_ptr.vmem [resolvable:$true] %s1230_s24 }
 0x458   : > { %v937_v5 = vpop.f32.mrf.mxu3 }
 0x459   : > { %v941_v6 = vmul.f32 0.35355338, %v937_v5 }
 0x45a   : > { %v873_v7 = vpop.f32.mrf.mxu0 }
 0x45b   : > { %v877_v8 = vmul.f32 0.35355338, %v873_v7  ;;  %v785_v10 = vpop.f32.mrf.mxu2  ;;  %v942_v11 = vsel %vm732_vm7, %v941_v6, -inf }
 0x45c   : > { %943 = vmax.xlane.f32.xlu0 %v942_v11 }
 0x45d   : > { %v878_v12 = vsel %vm732_vm7, %v877_v8, -inf }
 0x45e   : > { %879 = vmax.xlane.f32.xlu2 %v878_v12 }
 0x460   : > { %v939_v13 = vpop.f32.mrf.mxu3 }
 0x462   : > { %v875_v14 = vpop.f32.mrf.mxu0 }
 0x463   : > { %v809_v15 = vpop.f32.mrf.mxu2 }
 0x464   : > { %v813_v16 = vmul.f32 0.35355338, %v809_v15 }
 0x466   : > { %v814_v17 = vsel %vm732_vm7, %v813_v16, -inf }
 0x467   : > { %815 = vmax.xlane.f32.xlu1 %v814_v17  ;;  %v1519_v17 = vld [vmem:[%s1947_s18] sm:$0xff] }
 0x46b   : > { %v811_v18 = vpop.f32.mrf.mxu2 }
 0x476   : > { %954 = vrot.lane.b32.xlu2 %v1996_v38, %s1752_s13 }
 0x4cf   : > { %v944_v29 = vpop.xlane.xlu0 %943 }
 0x4d0   : > { %v945_v30 = vsub.f32 %v941_v6, %v944_v29 }
 0x4d1   : > { %v880_v19 = vpop.xlane.xlu2 %879 }
 0x4d2   : > { %v881_v20 = vsub.f32 %v877_v8, %v880_v19  ;;  %v946_v31 = vmul.f32 1.442695, %v945_v30 }
 0x4d4   : > { %v882_v21 = vmul.f32 1.442695, %v881_v20 }
 0x4d6   : > { %1631 = vpow2.f32 %v882_v21 }
 0x4d9   : > { %v955_v42 = vpop.permute.xlu2 %954 }
 0x4da   : > { %v816_v22 = vpop.xlane.xlu1 %815  ;;  %v960_v46 = vsel %vm770_vm6, %v955_v42, 0 }
 0x4db   : > { %v817_v23 = vsub.f32 %v813_v16, %v816_v22  ;;  %v1520_v16 = vld [vmem:[%s1947_s18 + $0x8] sm:$0xff] }
 0x4dc   : > { %v1632_v24 = vpop.eup %1631 }
 0x4dd   : > { %v818_v25 = vmul.f32 1.442695, %v817_v23  ;;  %v884_v26 = vsel %vm732_vm7, %v1632_v24, 0.0 }
 0x4de   : > { %885 = vadd.xlane.f32.xlu0 %v884_v26  ;;  %v1619_v26 = vld [vmem:[%s2190_s15] ss:$0 sm:$0xff] }
 0x4df   : > { %1633 = vpow2.f32 %v818_v25 }
 0x4e0   : > { %1635 = vpow2.f32 %v946_v31 }
 0x4e5   : > { %v1634_v27 = vpop.eup %1633 }
 0x4e6   : > { %v820_v28 = vsel %vm732_vm7, %v1634_v27, 0.0  ;;  %v1636_v32 = vpop.eup %1635 }
 0x4e7   : > { %821 = vadd.xlane.f32.xlu1 %v820_v28  ;;  %v948_v33 = vsel %vm732_vm7, %v1636_v32, 0.0  ;;  %v1620_v28 = vld [vmem:[%s623_s0] ss:$0 sm:$0xff]  ;;  %s2191_s0 = sld [smem:[#allocation10_spill]] }
 0x4f2   : > { %890 = vrot.lane.b32.xlu0 %v1996_v38, %s1753_s27 }
 0x500   : > { %826 = vrot.lane.b32.xlu1 %v1996_v38, %s1754_s29 }
 0x52a   : > { %949 = vadd.xlane.f32.xlu1 %v948_v33  ;;  %v1527_v33 = vld [vmem:[%s1961_s7 + $0x30] sm:$0xff] }
 0x551   : > { %v886_v34 = vpop.xlane.xlu0 %885 }
 0x552   : > { %1637 = vrcp.f32 %v886_v34  ;;  %v1621_v34 = vld [vmem:[%s631_s11] ss:$0 sm:$0xff]  ;;  %s1508_s11 = sshll.u32 %s2191_s0, 3 }
 0x558   : > { %v1638_v35 = vpop.eup %1637 }
 0x559   : > { %v888_v36 = vmul.f32 %v1638_v35, %v1632_v24 }
 0x55a   : > { %v822_v39 = vpop.xlane.xlu1 %821 }
 0x55b   : > { %v889_v41 = vpack.c.bf16 %v888_v36, %v888_v36  ;;  %1639 = vrcp.f32 %v822_v39  ;;  %v1526_v36 = vld [vmem:[%s1961_s7 + $0x28] sm:$0xff] }
 0x561   : > { %v1640_v38 = vpop.eup %1639 }
 0x562   : > { %v824_v43 = vmul.f32 %v1640_v38, %v1634_v27 }
 0x564   : > { %v891_v37 = vpop.permute.xlu0 %890  ;;  %v825_v47 = vpack.c.bf16 %v824_v43, %v824_v43  ;;  %v1524_v43 = vld [vmem:[%s1961_s7 + $0x18] sm:$0xff] }
 0x565   : > { %v896_v40 = vsel %vm770_vm6, %v891_v37, 0 }
 0x566   : > { %905 = vmatpush.bf16.msrb.mxu1 %v896_v40  ;;  %v1525_v40 = vld [vmem:[%s1961_s7 + $0x20] sm:$0xff] }
 0x569   : > { %1453 = vmatmul.msk.bf16.vlgmr.msrb.gmra.mxu1 %vm732_vm7, %v889_v41 }
 0x56a   : > { %1082 = vmatpush.bf16.msra.mxu1 %v1520_v16 }
 0x56e   : > { %1083 = vmatpush.bf16.msra.mxu1 %v1519_v17 }
 0x572   : > { %v827_v44 = vpop.permute.xlu1 %826 }
 0x573   : > { %v832_v45 = vsel %vm770_vm6, %v827_v44, 0 }
 0x574   : > { %841 = vmatpush.bf16.msra.mxu2 %v832_v45 }
 0x577   : > { %1451 = vmatmul.msk.bf16.vlgmr.msra.gmra.mxu2 %vm732_vm7, %v825_v47 }
 0x578   : > { %969 = vmatpush.bf16.msrb.mxu2 %v960_v46 }
 0x59d   : > { %v950_v48 = vpop.xlane.xlu1 %949 }
 0x59e   : > { %1641 = vrcp.f32 %v950_v48  ;;  %v1523_v48 = vld [vmem:[%s1961_s7 + $0x10] sm:$0xff] }
 0x5a4   : > { %v1642_v49 = vpop.eup %1641 }
 0x5a5   : > { %v952_v50 = vmul.f32 %v1642_v49, %v1636_v32  ;;  %v1528_v32 = vld [vmem:[%s1961_s7 + $0x38] sm:$0xff] }
 0x5a6   : > { %1202 = vmatpush.bf16.msrb.mxu3 %v1528_v32 }
 0x5a7   : > { %v953_v51 = vpack.c.bf16 %v952_v50, %v952_v50 }
 0x5a9   : > { %1455 = vmatmul.msk.bf16.vlgmr.msrb.gmra.mxu2 %vm732_vm7, %v953_v51  ;;  %v1522_v51 = vld [vmem:[%s1961_s7 + $0x8] sm:$0xff] }
 0x5aa   : > { %1203 = vmatpush.bf16.msrb.mxu3 %v1527_v33 }
 0x5ae   : > { %1204 = vmatpush.bf16.msrb.mxu3 %v1526_v36 }
 0x5b2   : > { %1205 = vmatpush.bf16.msrb.mxu3 %v1525_v40 }
 0x5b6   : > { %1206 = vmatpush.bf16.msrb.mxu3 %v1524_v43 }
 0x5ba   : > { %1207 = vmatpush.bf16.msrb.mxu3 %v1523_v48 }
 0x5be   : > { %1208 = vmatpush.bf16.msrb.mxu3 %v1522_v51 }
 0x5e6   : > { %v907_v52 = vpop.f32.mrf.mxu1 }
 0x5e7   : > { %v911_v53 = vpack.c.bf16 %v907_v52, %v907_v52 }
 0x5e9   : > { %913 = vrot.lane.b32.xlu0 %v911_v53, %s1755_s14 }
 0x5ee   : > { %v909_v54 = vpop.f32.mrf.mxu1 }
 0x5fa   : > { %v843_v55 = vpop.f32.mrf.mxu2 }
 0x5fb   : > { %v847_v56 = vpack.c.bf16 %v843_v55, %v843_v55  ;;  %v1521_v55 = vld [vmem:[%s1961_s7] sm:$0xff]  ;;  %s2192_s7 = sld [smem:[#allocation7_spill]] }
 0x5fc   : > { %1209 = vmatpush.bf16.msrb.mxu3 %v1521_v55 }
 0x5fd   : > { %849 = vrot.lane.b32.xlu2 %v847_v56, %s1756_s17 }
 0x601   : > { %s2196_s18 = sand.u32 1, %s2192_s7  }
 0x602   : > { %v845_v57 = vpop.f32.mrf.mxu2  ;;  %s1218_s16 = scalar_lea.sflag [#allocation4], %s2196_s18 }
 0x62c   : > { %v971_v58 = vpop.f32.mrf.mxu2 }
 0x62d   : > { %v975_v59 = vpack.c.bf16 %v971_v58, %v971_v58 }
 0x62f   : > { %977 = vrot.lane.b32.xlu2 %v975_v59, %s1757_s28  ;;  %s2194_s28 = sld [smem:[#allocation24_spill]] }
 0x634   : > { %v973_v60 = vpop.f32.mrf.mxu2 }
 0x635   : > { %s2195_s19 = smov %s2194_s28  ;;  %s1228_s22 = scalar_lea.hbm %s2194_s28, %s1508_s11 }
 0x636   : > { %s1232_s23 = sshll.u32 %s1228_s22, 4  ;;  %s1667_s20 = scalar_lea.hbm %s2195_s19, 16  ;;  %s1233_s23 = int_to_ptr.hbm [resolvable:$true] %s1232_s23 }
 0x637   : > { %s1661_s15 = sshra.s32 %s1233_s23, 4  ;;  %s1662_s15 = int_to_ptr.hbm [resolvable:$true] %s1661_s15 }
 0x638   : > { %s1663_s30 = scalar_lea.hbm %s1662_s15, 8  ;;  %p1668_p5 = scmp.lt.s32.totalorder %s1662_s15, %s2195_s19 }
 0x639   : > { %p1664_p1 = scmp.ne.s32.totalorder %s1662_s15, %s1663_s30  ;;  %p1669_p6 = scmp.lt.s32.totalorder %s1667_s20, %s1663_s30 }
 0x63b   : > { %p1665_p2 = pnand %p1664_p1, %p1877_p3  ;;  %p1670_p7 = por %p1669_p6, %p1668_p5 }
 0x63d   : > { %p1666_p4 = pneg %p1665_p2 }
 0x63f   : > { %p1671_p8 = pnand %p1670_p7, %p1666_p4 }
 0x657   : > { %v850_v62 = vpop.permute.xlu2 %849 }
 0x658   : > { %853 = vst.msk [vmem:[#allocation2] sm:$0xf] %vm852_vm9, %v850_v62 }
 0x65b   : > { %v914_v63 = vpop.permute.xlu0 %913 }
 0x65c   : > { %917 = vst.msk [vmem:[#allocation2] sm:$0xf] %vm916_vm10, %v914_v63 }
 0x689   : > { %v978_v2 = vpop.permute.xlu2 %977 }
 0x68a   : > { %981 = vst.msk [vmem:[#allocation2] sm:$0xf] %vm980_vm11, %v978_v2 }
 0x691   : > { %v982_v3 = vld [vmem:[#allocation2] sm:$0xf] }
 0x692   : > { %1464 = vmatmul.msk.bf16.vlgmr.msra.gmra.mxu0 %vm651_vm1, %v982_v3 }
 0x70f   : > { %v1015_v5 = vpop.f32.mrf.mxu0 }
 0x710   : > { %v1016_v6 = vadd.f32 %v1618_v4, %v1015_v5 }
 0x712   : > { %v2042_v7 = vadd.f32 %v1016_v6, %v1968_v1 }
 0x714   : > { %v1022_v8 = vsel %vm651_vm1, %v2042_v7, 0.0 }
 0x715   : > { %1023 = vadd.xlane.f32.xlu0 %v1022_v8 }
 0x717   : > { %v1017_v10 = vpop.f32.mrf.mxu0 }
 0x788   : > { %v1024_v11 = vpop.xlane.xlu0 %1023 }
 0x789   : > { %v1025_v12 = vmul.f32 %v1024_v11, %v1972_v9 }
 0x78b   : > { %v1026_v13 = vsub.f32 %v2042_v7, %v1025_v12 }
 0x78d   : > { %v1027_v14 = vmul.f32 %v1026_v13, %v1026_v13 }
 0x78f   : > { %v1028_v15 = vsel %vm651_vm1, %v1027_v14, 0.0 }
 0x790   : > { %1029 = vadd.xlane.f32.xlu1 %v1028_v15 }
 0x803   : > { %v1030_v1 = vpop.xlane.xlu1 %1029 }
 0x804   : > { %v1031_v18 = vmul.f32 %v1030_v1, %v1972_v9 }
 0x806   : > { %v1032_v19 = vadd.f32 1e-05, %v1031_v18 }
 0x808   : > { %1643 = vrsqrt.f32 %v1032_v19  ;;  %vm1039_vm13 = vweird.f32 %v1032_v19 }
 0x80e   : > { %v1644_v20 = vpop.eup %1643 }
 0x80f   : > { %v1034_v21 = vmul.f32 %v1644_v20, %v1032_v19  ;;  %vm1040_vm12 = vweird.f32 %v1644_v20 }
 0x810   : > { %vm1041_vm14 = vmor %vm1039_vm13, %vm1040_vm12 }
 0x811   : > { %v1035_v22 = vmul.f32 %v1644_v20, %v1034_v21 }
 0x813   : > { %v1036_v23 = vmul.f32 0.5, %v1035_v22  ;;  %v1622_v22 = vld [vmem:[%s639_s25] ss:$0 sm:$0xff] }
 0x815   : > { %v1037_v24 = vsub.f32 1.5, %v1036_v23 }
 0x817   : > { %v1038_v25 = vmul.f32 %v1644_v20, %v1037_v24 }
 0x819   : > { %v1042_v9 = vsel %vm1041_vm14, %v1644_v20, %v1038_v25 }
 0x81a   : > { %v1043_v27 = vmul.f32 %v1042_v9, %v1026_v13 }
 0x81c   : > { %v1047_v29 = vmul.f32 %v1619_v26, %v1043_v27 }
 0x81e   : > { %v1051_v30 = vadd.f32 %v1620_v28, %v1047_v29 }
 0x820   : > { %v1052_v31 = vpack.c.bf16 %v1051_v30, %v1051_v30 }
 0x822   : > { %1473 = vmatmul.msk.bf16.vlgmr.msra.gmra.mxu1 %vm651_vm1, %v1052_v31 }
 0x89f   : > { %v1085_v35 = vpop.f32.mrf.mxu1 }
 0x8a0   : > { %v1086_v37 = vadd.f32 %v1621_v34, %v1085_v35 }
 0x8a2   : > { %v1090_v39 = vmul.f32 0.70710677, %v1086_v37  ;;  %v1089_v18 = vmul.f32 0.5, %v1086_v37 }
 0x8a4   : > { %v1091_v41 = vmul.f32 %v1090_v39, %v1090_v39 }
 0x8a6   : > { %v1092_v38 = vmin.f32 %v1091_v41, 16.0 }
 0x8a7   : > { %v1087_v42 = vpop.f32.mrf.mxu1 }
 0x8a8   : > { %v1093_v44 = vmul.f32 2.1237322e-06, %v1092_v38  ;;  %v1104_v45 = vmul.f32 3.8918573e-05, %v1092_v38 }
 0x8aa   : > { %v1094_v46 = vadd.f32 0.00028619796, %v1093_v44  ;;  %v1105_v47 = vadd.f32 0.001143296, %v1104_v45 }
 0x8ac   : > { %v1095_v49 = vmul.f32 %v1094_v46, %v1092_v38  ;;  %v1106_v50 = vmul.f32 %v1105_v47, %v1092_v38 }
 0x8ae   : > { %v1107_v52 = vadd.f32 0.014752088, %v1106_v50  ;;  %v1096_v53 = vadd.f32 0.0036580483, %v1095_v49 }
 0x8b0   : > { %v1108_v54 = vmul.f32 %v1107_v52, %v1092_v38  ;;  %v1097_v57 = vmul.f32 %v1096_v53, %v1092_v38 }
 0x8b2   : > { %v1109_v56 = vadd.f32 0.112945676, %v1108_v54  ;;  %v1098_v60 = vadd.f32 0.05243302, %v1097_v57 }
 0x8b4   : > { %v1110_v58 = vmul.f32 %v1109_v56, %v1092_v38  ;;  %v1099_v63 = vmul.f32 %v1098_v60, %v1092_v38 }
 0x8b6   : > { %v1111_v59 = vadd.f32 0.4994258, %v1110_v58  ;;  %v1100_v0 = vadd.f32 0.18741608, %v1099_v63 }
 0x8b8   : > { %v1112_v61 = vmul.f32 %v1111_v59, %v1092_v38  ;;  %v1101_v3 = vmul.f32 %v1100_v0, %v1092_v38 }
 0x8ba   : > { %v1113_v62 = vadd.f32 1.0, %v1112_v61  ;;  %v1102_v8 = vadd.f32 1.1283791, %v1101_v3 }
 0x8bc   : > { %1645 = vrcp.f32 %v1113_v62  ;;  %v1125_v6 = vand.u32 2147483648, %v1113_v62  ;;  %v1123_v11 = vand.u32 2147483647, %v1113_v62  ;;  %vm1119_vm0 = vweird.f32 %v1113_v62 }
 0x8bd   : > { %v1103_v14 = vmul.f32 %v1102_v8, %v1090_v39 }
 0x8be   : > { %v1126_v13 = vor.u32 1.1754944e-38, %v1125_v6  ;;  %vm1124_vm3 = vcmp.eq.f32.partialorder %v1123_v11, 8.507059e+37 }
 0x8c2   : > { %v1646_v2 = vpop.eup %1645 }
 0x8c3   : > { %v1115_v4 = vmul.f32 %v1646_v2, %v1113_v62  ;;  %vm1120_vm15 = vweird.f32 %v1646_v2 }
 0x8c4   : > { %vm1121_vm2 = vmor %vm1119_vm0, %vm1120_vm15 }
 0x8c5   : > { %v1116_v5 = vsub.f32 1.0, %v1115_v4 }
 0x8c7   : > { %v1117_v10 = vmul.f32 %v1646_v2, %v1116_v5 }
 0x8c9   : > { %v1118_v12 = vadd.f32 %v1646_v2, %v1117_v10 }
 0x8cb   : > { %v1122_v15 = vsel %vm1121_vm2, %v1646_v2, %v1118_v12 }
 0x8cc   : > { %v1127_v16 = vsel %vm1124_vm3, %v1126_v13, %v1122_v15 }
 0x8cd   : > { %v1128_v17 = vmul.f32 %v1127_v16, %v1103_v14 }
 0x8cf   : > { %v1474_v1 = vclamps-f32 %v1128_v17, 1.0 }
 0x8d1   : > { %v1131_v19 = vadd.f32 1.0, %v1474_v1 }
 0x8d3   : > { %v1132_v20 = vmul.f32 %v1131_v19, %v1089_v18 }
 0x8d5   : > { %v1133_v21 = vpack.c.bf16 %v1132_v20, %v1132_v20 }
 0x8d7   : > { %1210 = vmatmul.bf16.vlgmr.msrb.gmra.mxu3 %v1133_v21 }
 0x95a   : > { %v1211_v23 = vpop.f32.mrf.mxu3 }
 0x95b   : > { %v1212_v24 = vadd.f32 %v1622_v22, %v1211_v23 }
 0x95d   : > { %v1215_v25 = vadd.f32 %v1212_v24, %v2042_v7 }
 0x95f   : > { %1216 = vst.msk [vmem:[%s1963_s26] sm:$0xff] %vm651_vm1, %v1215_v25 }
 0x960   : > { %1674 = shalt.err (!%p1671_p8)
}
 0x961   : > { %1529 = dma.vmem_to_hbm [thread:$0]  (%p1877_p3), %s1231_s24, 128, %s1233_s23, %s1218_s16  }
 0x962   : > { %v1213_v7 = vpop.f32.mrf.mxu3 }
 0x963 PF: > { %s2197_s26 = sld [smem:[#allocation13_spill]] }
 0x964   : > { %s2198_s0 = sld [smem:[#allocation6_spill]] }
 0x969   : > { %p1535_p10 = scmp.ge.s32.totalorder %s2197_s26, 2 }
 0x96a   : > { %s1244_s11 = sand.u32 1, %s2198_s0  }
 0x96b   : > { %p1532_p11 = pnand %p1535_p10, %p1887_p9  ;;  %s1245_s13 = scalar_lea.sflag [#allocation4], %s1244_s11 }
 0x96d   : > { %p1533_p12 = pneg %p1532_p11 }
 0x96f   : > { %1708 = dma.done.wait (%p1533_p12), %s1245_s13, 128  }
 0x970   : > { %1710 = vsyncadd (%p1533_p12), %s1245_s13, 4294967168  ;;  %s26_s15 = sadd.s32 1, %s2197_s26   ;;  %s2200_s25 = sld [smem:[#allocation7_spill]] }
 0x971   : > { %p23_p13 = scmp.ge.s32.totalorder %s26_s15, 6   ;;  %s2201_s26 = sld [smem:[#allocation8_spill]] }
 0x972   : > { %s2202_s27 = sld [smem:[#allocation18_spill]] }
 0x973   : > { %s2203_s28 = sld [smem:[#allocation11_spill]]  ;;  %25 = sbr.rel (!%p23_p13) target bundleno = 12 (0xc), region = 147 }
 0x974   : > { %s2204_s29 = sld [smem:[#allocation12_spill]] }
 0x975   : > { %s2205_s30 = sld [smem:[#allocation14_spill]] }
 0x976   : > { %s2206_s14 = sld [smem:[#allocation16_spill]] }
 0x978   :  { %1251 = vsyncpa [#allocation4], 1 }
 0x979   :  { %1253 = vsyncpa [#allocation4 + $0x1], 1 }

</bundles_post_ra>
